<compile_context>
chip_gen: v7x
topology: tpu7x:2x2x1
jax: 0.10.0
libtpu: 0.0.40
codegen_flags: <defaults>
</compile_context>

<pallas_src>
import jax
import jax.numpy as jnp
from jax import lax
from jax.experimental import pallas as pl
from jax.experimental.pallas import tpu as pltpu


# ~1 MiB input blocks: past the ~512 KiB knee where streaming reaches ~85% of
# HBM roofline, while double-buffered inputs + f32 intermediates stay well
# inside a 32 MiB scoped-VMEM budget on every generation (incl. v7x's 64 MiB
# physical VMEM).
_DEFAULT_BLOCK_BYTES = 1 << 20
_VMEM_LIMIT_BYTES = 32 * 1024 * 1024


def _choose_blocking(n, slice_bytes, block_bytes):
    """Pick (tb, n_cores, n_inner): tb slices per grid step (tb divides n),
    a 2-way parallel (megacore) axis when the step count is even, and the
    number of accumulation steps per parallel index."""
    tb_cap = max(1, min(n, block_bytes // max(slice_bytes, 1)))
    tb = 1
    for cand in range(int(tb_cap), 0, -1):
        if n % cand == 0:
            tb = cand
            break
    steps = n // tb
    n_cores = 2 if (steps >= 2 and steps % 2 == 0) else 1
    return tb, n_cores, steps // n_cores


def regularization_loss(mesh, *, block_bytes=_DEFAULT_BLOCK_BYTES):
    """mesh: (B, C, X, Y, Z) float array. Returns the scalar f32 loss."""
    B, C, X, Y, Z = mesh.shape
    if X < 2 or Y < 2 or Z < 2:
        return jnp.float32(0.0)          # the PyTorch loops never execute

    n = B * C
    m = mesh.reshape(n, X, Y, Z)         # free reshape, keep native dtype
    itemsize = jnp.dtype(m.dtype).itemsize
    slice_bytes = X * Y * Z * itemsize
    tb, n_cores, n_inner = _choose_blocking(n, slice_bytes, block_bytes)
    inv_bc = 1.0 / float(n)              # every MSE term divides by B*C

    def kernel(m_ref, out_ref, acc_ref):
        i = pl.program_id(1)             # accumulation ("arbitrary") axis

        @pl.when(i == 0)
        def _init():
            acc_ref[...] = jnp.zeros_like(acc_ref)

        m_blk = m_ref[...].astype(jnp.float32)        # (tb, X, Y, Z) f32 in VMEM
        a = m_blk[:, : X - 1]                          # anchors; free major-axis slice
        dx = a - m_blk[:, 1:]                          # +1 neighbour along X
        dy = a - pltpu.roll(a, shift=Y - 1, axis=2)    # +1 along Y (sublane rotate)
        dz = a - pltpu.roll(a, shift=Z - 1, axis=3)    # +1 along Z (lane rotate)

        # Boundary mask for the rolled axes (x < X-1 is handled by the slice).
        iy = lax.broadcasted_iota(jnp.int32, (Y, Z), 0)
        iz = lax.broadcasted_iota(jnp.int32, (Y, Z), 1)
        mask = ((iy < Y - 1) & (iz < Z - 1)).astype(jnp.float32)

        sq = (dx * dx + dy * dy + dz * dz) * mask      # (tb, X-1, Y, Z)
        acc_ref[...] += jnp.sum(sq, axis=(0, 1))       # (Y, Z) partial; pure VPU adds

        @pl.when(i == pl.num_programs(1) - 1)
        def _finalize():
            total = jnp.sum(acc_ref[...]) * inv_bc     # one cross-lane reduce
            out_ref[...] = jnp.full((1, 1, 1), total, dtype=jnp.float32)

    out = pl.pallas_call(
        kernel,
        grid=(n_cores, n_inner),
        in_specs=[pl.BlockSpec((tb, X, Y, Z),
                               lambda p, i: (p * n_inner + i, 0, 0, 0))],
        out_specs=pl.BlockSpec((1, 1, 1), lambda p, i: (p, 0, 0)),
        out_shape=jax.ShapeDtypeStruct((n_cores, 1, 1), jnp.float32),
        scratch_shapes=[pltpu.VMEM((Y, Z), jnp.float32)],
        compiler_params=pltpu.CompilerParams(
            dimension_semantics=("parallel", "arbitrary"),
            vmem_limit_bytes=_VMEM_LIMIT_BYTES),
        cost_estimate=pl.CostEstimate(
            flops=9 * n * (X - 1) * (Y - 1) * (Z - 1),
            transcendentals=0,
            bytes_accessed=n * X * Y * Z * itemsize + n_cores * 4),
    )(m)
    return jnp.sum(out)                  # sum per-core partial losses -> scalar


def _reference_loss(mesh):
    """Pure-JAX reference matching the PyTorch triple loop exactly."""
    B, C = mesh.shape[:2]
    m = mesh.astype(jnp.float32)
    sub = m[:, :, :-1, :-1, :-1]
    dx = sub - m[:, :, 1:, :-1, :-1]
    dy = sub - m[:, :, :-1, 1:, :-1]
    dz = sub - m[:, :, :-1, :-1, 1:]
    return jnp.sum(dx * dx + dy * dy + dz * dz) / (B * C)


if __name__ == "__main__":
    key = jax.random.PRNGKey(0)
    B, C, X, Y, Z = 2, 4, 6, 8, 128      # lane-dense Z (= 128 lanes) per perf guidance
    mesh = jax.random.normal(key, (B, C, X, Y, Z), dtype=jnp.float32)

    # Small block budget so the tiny demo still exercises the multi-step
    # accumulation + two-partial-sum (megacore) path; real sizes use the
    # ~1 MiB default.
    loss = regularization_loss(mesh, block_bytes=64 * 1024)
    loss = jax.block_until_ready(loss)

    ref = jax.block_until_ready(_reference_loss(mesh))
    assert jnp.allclose(loss, ref, rtol=1e-4, atol=1e-3), (loss, ref)

    print("KERNEL_OK")
</pallas_src>

<mosaic_0001>
module attributes {stable_mosaic.version = 11 : i64} {
  func.func @kernel(%arg0: i32, %arg1: i32, %arg2: memref<2x6x8x128xf32, #tpu.memory_space<vmem>>, %arg3: memref<1x1x1xf32, #tpu.memory_space<vmem>>, %arg4: memref<8x128xf32, #tpu.memory_space<vmem>>) attributes {dimension_semantics = [#tpu.dimension_semantics<parallel>, #tpu.dimension_semantics<arbitrary>], iteration_bounds = array<i64: 2, 2>, scalar_prefetch = 0 : i64, scratch_operands = 1 : i64, tpu.core_type = #tpu.core_type<tc>, window_params = [{transform_indices = @transform_0, window_bounds = array<i64: 2, 6, 8, 128>}, {transform_indices = @transform_1, window_bounds = array<i64: 1, 1, 1>}]} {
    %c0_i32 = arith.constant 0 : i32
    %0 = arith.cmpi eq, %arg1, %c0_i32 : i32
    %1 = arith.extui %0 : i1 to i32
    %c0_i32_0 = arith.constant 0 : i32
    %2 = arith.cmpi ne, %1, %c0_i32_0 : i32
    scf.if %2 {
      %cst_11 = arith.constant 0.000000e+00 : f32
      %35 = vector.broadcast %cst_11 : f32 to vector<8x128xf32>
      %c0_12 = arith.constant 0 : index
      %c0_13 = arith.constant 0 : index
      %36 = vector.load %arg4[%c0_12, %c0_13] : memref<8x128xf32, #tpu.memory_space<vmem>>, vector<8x128xf32>
      tpu.vector_store %arg4[%c0_12, %c0_13], %35 {strides = array<i32>} : memref<8x128xf32, #tpu.memory_space<vmem>>, vector<8x128xf32>,
    } else {
    }
    %c0 = arith.constant 0 : index
    %c0_1 = arith.constant 0 : index
    %c0_2 = arith.constant 0 : index
    %c0_3 = arith.constant 0 : index
    %3 = vector.load %arg2[%c0, %c0_1, %c0_2, %c0_3] : memref<2x6x8x128xf32, #tpu.memory_space<vmem>>, vector<2x6x8x128xf32>
    %4 = vector.extract_strided_slice %3 {offsets = [0, 0, 0, 0], sizes = [2, 5, 8, 128], strides = [1, 1, 1, 1]} : vector<2x6x8x128xf32> to vector<2x5x8x128xf32>
    %5 = vector.extract_strided_slice %3 {offsets = [0, 1, 0, 0], sizes = [2, 5, 8, 128], strides = [1, 1, 1, 1]} : vector<2x6x8x128xf32> to vector<2x5x8x128xf32>
    %6 = arith.subf %4, %5 : vector<2x5x8x128xf32>
    %c7_i32 = arith.constant 7 : i32
    %7 = tpu.dynamic_rotate %4 by %c7_i32 dim 2 : vector<2x5x8x128xf32>, i32 -> vector<2x5x8x128xf32>
    %8 = arith.subf %4, %7 : vector<2x5x8x128xf32>
    %c127_i32 = arith.constant 127 : i32
    %9 = tpu.dynamic_rotate %4 by %c127_i32 dim 3 : vector<2x5x8x128xf32>, i32 -> vector<2x5x8x128xf32>
    %10 = arith.subf %4, %9 : vector<2x5x8x128xf32>
    %11 = tpu.iota {dimensions = array<i32: 0>} : vector<8x128xi32>
    %12 = tpu.iota {dimensions = array<i32: 1>} : vector<8x128xi32>
    %c7_i32_4 = arith.constant 7 : i32
    %13 = vector.broadcast %c7_i32_4 : i32 to vector<8x128xi32>
    %14 = arith.cmpi slt, %11, %13 : vector<8x128xi32>
    %c127_i32_5 = arith.constant 127 : i32
    %15 = vector.broadcast %c127_i32_5 : i32 to vector<8x128xi32>
    %16 = arith.cmpi slt, %12, %15 : vector<8x128xi32>
    %17 = arith.andi %14, %16 : vector<8x128xi1>
    %18 = arith.extui %17 : vector<8x128xi1> to vector<8x128xi32>
    %19 = arith.sitofp %18 : vector<8x128xi32> to vector<8x128xf32>
    %20 = arith.mulf %6, %6 : vector<2x5x8x128xf32>
    %21 = arith.mulf %8, %8 : vector<2x5x8x128xf32>
    %22 = arith.addf %20, %21 : vector<2x5x8x128xf32>
    %23 = arith.mulf %10, %10 : vector<2x5x8x128xf32>
    %24 = arith.addf %22, %23 : vector<2x5x8x128xf32>
    %25 = vector.shape_cast %19 : vector<8x128xf32> to vector<1x1x8x128xf32>
    %26 = vector.broadcast %25 : vector<1x1x8x128xf32> to vector<2x5x8x128xf32>
    %27 = arith.mulf %24, %26 : vector<2x5x8x128xf32>
    %c0_6 = arith.constant 0 : index
    %c0_7 = arith.constant 0 : index
    %28 = vector.load %arg4[%c0_6, %c0_7] : memref<8x128xf32, #tpu.memory_space<vmem>>, vector<8x128xf32>
    %cst = arith.constant dense<0.000000e+00> : vector<8x128xf32>
    %29 = vector.multi_reduction <add>, %27, %cst [0, 1] : vector<2x5x8x128xf32> to vector<8x128xf32>
    %30 = arith.addf %28, %29 : vector<8x128xf32>
    %c0_8 = arith.constant 0 : index
    %c0_9 = arith.constant 0 : index
    %31 = vector.load %arg4[%c0_8, %c0_9] : memref<8x128xf32, #tpu.memory_space<vmem>>, vector<8x128xf32>
    tpu.vector_store %arg4[%c0_8, %c0_9], %30 {strides = array<i32>} : memref<8x128xf32, #tpu.memory_space<vmem>>, vector<8x128xf32>,
    %c1_i32 = arith.constant 1 : i32
    %32 = arith.cmpi eq, %arg1, %c1_i32 : i32
    %33 = arith.extui %32 : i1 to i32
    %c0_i32_10 = arith.constant 0 : i32
    %34 = arith.cmpi ne, %33, %c0_i32_10 : i32
    scf.if %34 {
      %c0_11 = arith.constant 0 : index
      %c0_12 = arith.constant 0 : index
      %35 = vector.load %arg4[%c0_11, %c0_12] : memref<8x128xf32, #tpu.memory_space<vmem>>, vector<8x128xf32>
      %36 = vector.shape_cast %35 : vector<8x128xf32> to vector<1x8x128xf32>
      %cst_13 = arith.constant dense<0.000000e+00> : vector<1xf32>
      %37 = vector.multi_reduction <add>, %36, %cst_13 [1, 2] : vector<1x8x128xf32> to vector<1xf32>
      %38 = vector.shape_cast %37 : vector<1xf32> to vector<1x1x1xf32>
      %39 = vector.extract %38[0, 0, 0] : f32 from vector<1x1x1xf32>
      %cst_14 = arith.constant 1.250000e-01 : f32
      %40 = arith.mulf %39, %cst_14 : f32
      %41 = vector.broadcast %40 : f32 to vector<1x1x1xf32>
      %c0_15 = arith.constant 0 : index
      %c0_16 = arith.constant 0 : index
      %c0_17 = arith.constant 0 : index
      %42 = vector.load %arg3[%c0_15, %c0_16, %c0_17] : memref<1x1x1xf32, #tpu.memory_space<vmem>>, vector<1x1x1xf32>
      tpu.vector_store %arg3[%c0_15, %c0_16, %c0_17], %41 {strides = array<i32>} : memref<1x1x1xf32, #tpu.memory_space<vmem>>, vector<1x1x1xf32>,
    } else {
    }
    return
  }
  func.func @transform_0(%arg0: i32, %arg1: i32) -> (i32, i32, i32, i32) {
    %c2_i32 = arith.constant 2 : i32
    %0 = arith.muli %arg0, %c2_i32 : i32
    %1 = arith.addi %0, %arg1 : i32
    %c0_i32 = arith.constant 0 : i32
    %c0_i32_0 = arith.constant 0 : i32
    %c0_i32_1 = arith.constant 0 : i32
    %c0_i32_2 = arith.constant 0 : i32
    return %1, %c0_i32, %c0_i32_0, %c0_i32_1 : i32, i32, i32, i32
  }
  func.func @transform_1(%arg0: i32, %arg1: i32) -> (i32, i32, i32) {
    %c0_i32 = arith.constant 0 : i32
    %c0_i32_0 = arith.constant 0 : i32
    %c0_i32_1 = arith.constant 0 : i32
    return %arg0, %c0_i32, %c0_i32_0 : i32, i32, i32
  }
}

</mosaic_0001>

<bundles_post_ra>
// kernel: tpu_custom_call.1
= control target key start
LH: loop header
LB: loop body
LE: loop exit
PB: predicated region body
PF: predicated region fallthrough
CT: control target
= control target key end

     0   :  { %6 = vsyncpa [#allocation4], 0  ;;  %s852_s0 = inlined_call_operand.hbm [shape: f32[8,6,8,128], index: 0, kind: input, shape index: {}]   ;;  %s853_s1 = inlined_call_operand.vmem [shape: f32[2,1,1], index: 1, kind: output, shape index: {}]  }
   0x1   :  { %8 = vsyncpa [#allocation4 + $0x1], 0  ;;  %s614_s6 = smov 0   ;;  %s616_s7 = smov 0  }
   0x2   :  { %s618_s8 = smov 0   ;;  %s620_s9 = smov 0  }
   0x3   :  { %s622_s10 = smov 0   ;;  %s624_s11 = smov 0  }
   0x4   :  { %s626_s12 = smov 0   ;;  %s628_s13 = smov 0  }
   0x5 LB: > { %s403_s14 = sadd.s32 4294967295, %s596_s13   ;;  %s23_s15 = sadd.s32 1, %s588_s11  ;;  %s596_s13 = sphi %s628_s13, %s14_s13   ;;  %s592_s12 = sphi %s626_s12, %s862_s12   ;;  %s588_s11 = sphi %s624_s11, %s861_s11   ;;  %s584_s10 = sphi %s622_s10, %s860_s10   ;;  %s580_s9 = sphi %s620_s9, %s859_s9   ;;  %s576_s8 = sphi %s618_s8, %s858_s8   ;;  %s572_s7 = sphi %s616_s7, %s857_s7   ;;  %s568_s6 = sphi %s614_s6, %s856_s6  }
   0x6   : > { %p24_p0 = scmp.ge.s32.totalorder %s23_s15, 2  ;;  %s26_s16 = sadd.s32 1, %s592_s12 }
   0x7   : > { %s405_s17 = sshll.u32 %s592_s12, 1  ;;  %s37_s18 = sadd.s32 1, %s576_s8 }
   0x8   : > { %s864_s15 = smov (%p24_p0, %s23_s15), 0  ;;  %s866_s16 = smov (!%p24_p0, %s26_s16), %s592_s12 }
   0x9   : > { %s31_s19 = sadd.s32 %s588_s11, %s405_s17  ;;  %p44_p1 = scmp.ne.s32.totalorder %s576_s8, %s572_s7 }
   0xa   : > { %p28_p2 = scmp.ge.s32.totalorder %s866_s16, 2  ;;  %p45_p3 = scmp.eq.s32.totalorder %s596_s13, 0 }
   0xb   : > { %p50_p4 = scmp.ne.s32.totalorder %s572_s7, %s568_s6  ;;  %p51_p5 = scmp.eq.s32.totalorder %s403_s14, 0 }
   0xc   : > { %s868_s16 = smov (%p28_p2, %s866_s16), 0  ;;  %p46_p6 = por %p45_p3, %p44_p1 }
   0xd   : > { %p667_p7 = por %p51_p5, %p50_p4  ;;  %s406_s21 = sshll.u32 %s868_s16, 1 }
   0xe   : > { %s33_s22 = sadd.s32 %s406_s21, %s864_s15  ;;  %p430_p8 = scmp.lt.s32.totalorder %s596_s13, 4 }
   0xf   : > { %s34_s23 = ssub.s32 %s31_s19, %s33_s22  ;;  %s100_s24 = sand.u32 1, %s576_s8  }
  0x10   : > { %p35_p9 = scmp.eq.s32.totalorder %s34_s23, 0  ;;  %s419_s25 = smul.u32 96, %s100_s24 }
  0x11   : > { %p675_p10 = pnand %p430_p8, %p46_p6  ;;  %s420_s28 = smul.u32 1536, %s31_s19 }
  0x12   : > { %s680_s27 = scalar_select %p35_p9, %s576_s8, %s37_s18  }
  0x13   : > { %s104_s29 = scalar_lea.vmem [#allocation3], %s419_s25  ;;  %s685_s4 = scalar_lea.hbm %s852_s0, %s420_s28 }
  0x14   : > { %s114_s30 = sshll.u32 %s104_s29, 4  ;;  %s689_s5 = scalar_lea.sflag [#allocation4], %s100_s24  ;;  %s687_s30 = int_to_ptr.vmem [resolvable:$true] %s114_s30 }
  0x15   : > { %s500_s6 = scalar_lea.hbm %s685_s4, 1536  ;;  %p502_p12 = pneg %p675_p10 }
  0x16   : > { %p501_p11 = scmp.ne.s32.totalorder %s685_s4, %s500_s6  ;;  %s505_s18 = scalar_lea.hbm %s852_s0, 6144 }
  0x17   : > { %p506_p1 = scmp.lt.u32.totalorder %s685_s4, %s852_s0  ;;  %p507_p2 = scmp.lt.u32.totalorder %s505_s18, %s500_s6 }
  0x18   : > { %p503_p13 = pnand %p502_p12, %p501_p11  ;;  %p509_p4 = scmp.lt.u32.totalorder %s500_s6, %s685_s4 }
  0x19   : > { %p508_p3 = por %p507_p2, %p506_p1 }
  0x1a   : > { %p504_p0 = pneg %p503_p13 }
  0x1b   : > { %p510_p5 = por %p509_p4, %p508_p3 }
  0x1d   : > { %p511_p6 = pnand %p510_p5, %p504_p0 }
  0x1f   : > { %514 = shalt.err (!%p511_p6)
}
  0x20   : > { %s515_s22 = scalar_lea.vmem %s687_s30, 1536  ;;  %s598_s23 = smov [#allocation3]  }
  0x21   : > { %p516_p8 = scmp.ne.s32.totalorder %s687_s30, %s515_s22  ;;  %s520_s24 = sshll.u32 %s598_s23, 4  ;;  %s521_s24 = int_to_ptr.vmem [resolvable:$false] %s520_s24 }
  0x22   : > { %s522_s25 = scalar_lea.vmem %s521_s24, 3072  ;;  %p523_p13 = scmp.lt.s32.totalorder %s687_s30, %s521_s24 }
  0x23   : > { %p518_p9 = pnand %p516_p8, %p502_p12  ;;  %p524_p1 = scmp.lt.s32.totalorder %s522_s25, %s515_s22 }
  0x25   : > { %p519_p11 = pneg %p518_p9  ;;  %p525_p2 = por %p524_p1, %p523_p13 }
  0x27   : > { %p526_p3 = pnand %p525_p2, %p519_p11 }
  0x29   : > { %529 = shalt.err (!%p526_p3)
}
  0x2a   : > { %s599_s28 = smov 128   ;;  %s600_s29 = smov 8  }
  0x2b   : > { %429 = dma.hbm_to_vmem [thread:$0]  (!%p675_p10), %s685_s4, 1536, %s687_s30, %s689_s5, %s599_s28, %s599_s28, %s600_s29  }
  0x2c   : > { %p413_p12 = scmp.ge.s32.totalorder %s596_s13, 1  ;;  %p122_p0 = scmp.lt.s32.totalorder %s596_s13, 5 }
  0x2e   : > { %p123_p4 = pnand %p413_p12, %p122_p0 }
  0x2f   : > { %s128_s2 = sand.u32 (!%p123_p4), 1, %s572_s7  }
  0x30   : > { %126 = sbr.rel (%p123_p4) target bundleno = 429 (0x1ad), region = 24  ;;  %s129_s6 = scalar_lea.sflag (!%p123_p4), [#allocation4], %s128_s2 }
  0x31   : > { %s421_s3 = smul.u32 (!%p123_p4), 96, %s128_s2 }
  0x33   : > { %s720_s14 = scalar_lea.vmem (!%p123_p4), [#allocation3], %s421_s3 }
  0x37   : > { %563 = dma.done.wait (%p667_p7), %s129_s6, 1536  }
  0x38   : > { %565 = vsyncadd (%p667_p7), %s129_s6, 4294965760  ;;  %p152_p5 = scmp.lt.s32.totalorder %s584_s10, 1  ;;  %p414_p10 = scmp.ne.s32.totalorder %s580_s9, 0 }
  0x39   : > { %v601_v0 = vmov (!%p414_p10), 0.0  }
  0x3a   : > { %s870_s10 = smov (!%p152_p5, %s584_s10), 1  ;;  %158 = sbr.rel (%p414_p10) target bundleno = 65 (0x41), region = 32 }
  0x3b   : > { %s154_s4 = scalar_lea.vmem %s853_s1, %s870_s10  ;;  %159 = vst [vmem:[#allocation2] sm:$0xff] (!%p414_p10), %v601_v0 }
  0x41 PF: > { %v160_v1 = vld [vmem:[%s720_s14] sm:$0xff]  ;;  %v162_v2 = vld [vmem:[%s720_s14 + $0x10] sm:$0xff]  ;;  %s602_s20 = smov 127   ;;  %v738_v3 = vld [vmem:[%s720_s14 + $0x8] sm:$0xff]  ;;  %v232_v11 = vlaneseq  ;;  %v603_v41 = vmov 0.0   ;;  %p416_p7 = scmp.ne.s32.totalorder %s580_s9, 1 }
  0x42   : > { %202 = vrot.lane.b32.xlu0 %v160_v1, %s602_s20  ;;  %206 = vrot.lane.b32.xlu1 %v162_v2, %s602_s20  ;;  %v741_v4 = vld [vmem:[%s720_s14 + $0x18] sm:$0xff]  ;;  %v746_v5 = vld [vmem:[%s720_s14 + $0x20] sm:$0xff]  ;;  %v182_v12 = vrot.slane %v160_v1, 1  ;;  %v184_v15 = vrot.slane %v162_v2, 1  ;;  %v183_v16 = vrot.slane %v738_v3, 1  ;;  %v172_v18 = vsub.f32 %v160_v1, %v738_v3 }
  0x43   : > { %v749_v6 = vld [vmem:[%s720_s14 + $0x30] sm:$0xff]  ;;  %v754_v7 = vld [vmem:[%s720_s14 + $0x38] sm:$0xff]  ;;  %v757_v8 = vld [vmem:[%s720_s14 + $0x40] sm:$0xff]  ;;  %v233_v13 = vshrl.u32 %v232_v11, 7  ;;  %v235_v14 = vand.u32 127, %v232_v11  ;;  %v185_v17 = vrot.slane %v741_v4, 1  ;;  %v174_v20 = vsub.f32 %v162_v2, %v741_v4 }
  0x44   : > { %v762_v9 = vld [vmem:[%s720_s14 + $0x48] sm:$0xff]  ;;  %v765_v10 = vld [vmem:[%s720_s14 + $0x50] sm:$0xff]  ;;  %v192_v19 = vsub.f32 %v160_v1, %v182_v12  ;;  %v173_v21 = vsub.f32 %v738_v3, %v162_v2  ;;  %v186_v23 = vrot.slane %v746_v5, 1  ;;  %v194_v24 = vsub.f32 %v162_v2, %v184_v15  ;;  %v171_v60 = vld [vmem:[%s720_s14 + $0x58] sm:$0xff] }
  0x45   : > { %v165_v22 = vld [vmem:[%s720_s14 + $0x28] sm:$0xff]  ;;  %vm236_vm0 = vcmp.lt.s32.totalorder %v233_v13, 7  ;;  %vm237_vm1 = vcmp.lt.s32.totalorder %v235_v14, 127  ;;  %v193_v25 = vsub.f32 %v738_v3, %v183_v16  ;;  %v175_v26 = vsub.f32 %v741_v4, %v746_v5 }
  0x46   : > { %204 = vrot.lane.b32.xlu0 %v738_v3, %s602_s20  ;;  %208 = vrot.lane.b32.xlu1 %v741_v4, %s602_s20  ;;  %v195_v27 = vsub.f32 %v741_v4, %v185_v17  ;;  %v241_v28 = vmul.f32 %v172_v18, %v172_v18  ;;  %v251_v29 = vmul.f32 %v192_v19, %v192_v19  ;;  %v187_v31 = vrot.slane %v749_v6, 1  ;;  %vm238_vm2 = vmand %vm236_vm0, %vm237_vm1 }
  0x47   : > { %v176_v30 = vsub.f32 %v746_v5, %v165_v22  ;;  %v242_v32 = vmul.f32 %v173_v21, %v173_v21  ;;  %v196_v33 = vsub.f32 %v746_v5, %v186_v23  ;;  %v243_v34 = vmul.f32 %v174_v20, %v174_v20 }
  0x48   : > { %v253_v35 = vmul.f32 %v194_v24, %v194_v24  ;;  %v252_v36 = vmul.f32 %v193_v25, %v193_v25  ;;  %v188_v37 = vrot.slane %v754_v7, 1  ;;  %v244_v38 = vmul.f32 %v175_v26, %v175_v26 }
  0x49   : > { %v254_v39 = vmul.f32 %v195_v27, %v195_v27  ;;  %v177_v40 = vsub.f32 %v749_v6, %v754_v7  ;;  %v786_v42 = vsel %vm238_vm2, 1.0, %v603_v41  ;;  %v261_v44 = vadd.f32 %v251_v29, %v241_v28 }
  0x4a   : > { %210 = vrot.lane.b32.xlu0 %v746_v5, %s602_s20  ;;  %212 = vrot.lane.b32.xlu1 %v749_v6, %s602_s20  ;;  %v245_v46 = vmul.f32 %v176_v30, %v176_v30  ;;  %v197_v47 = vsub.f32 %v749_v6, %v187_v31  ;;  %v255_v50 = vmul.f32 %v196_v33, %v196_v33  ;;  %v189_v55 = vrot.slane %v757_v8, 1 }
  0x4b   : > { %v178_v51 = vsub.f32 %v754_v7, %v757_v8  ;;  %v263_v52 = vadd.f32 %v253_v35, %v243_v34  ;;  %v262_v53 = vadd.f32 %v252_v36, %v242_v32  ;;  %v198_v54 = vsub.f32 %v754_v7, %v188_v37 }
  0x4c   : > { %v264_v57 = vadd.f32 %v254_v39, %v244_v38  ;;  %v246_v58 = vmul.f32 %v177_v40, %v177_v40  ;;  %v179_v59 = vsub.f32 %v757_v8, %v762_v9  ;;  %v256_v0 = vmul.f32 %v197_v47, %v197_v47 }
  0x4d   : > { %v265_v13 = vadd.f32 %v255_v50, %v245_v46  ;;  %v247_v14 = vmul.f32 %v178_v51, %v178_v51  ;;  %v257_v15 = vmul.f32 %v198_v54, %v198_v54  ;;  %v199_v16 = vsub.f32 %v757_v8, %v189_v55 }
  0x4e   : > { %214 = vrot.lane.b32.xlu0 %v754_v7, %s602_s20  ;;  %216 = vrot.lane.b32.xlu1 %v757_v8, %s602_s20  ;;  %v180_v17 = vsub.f32 %v762_v9, %v765_v10  ;;  %v181_v18 = vsub.f32 %v765_v10, %v171_v60  ;;  %v248_v22 = vmul.f32 %v179_v59, %v179_v59  ;;  %vm329_vm3 = vcmask (!%p416_p7), 0  }
  0x4f   : > { %v266_v25 = vadd.f32 %v256_v0, %v246_v58  ;;  %v267_v31 = vadd.f32 %v257_v15, %v247_v14  ;;  %v258_v32 = vmul.f32 %v199_v16, %v199_v16 }
  0x50   : > { %v249_v33 = vmul.f32 %v180_v17, %v180_v17  ;;  %v250_v34 = vmul.f32 %v181_v18, %v181_v18  ;;  %v301_v18 = vld [vmem:[#allocation2] sm:$0xff] }
  0x52   : > { %218 = vrot.lane.b32.xlu0 %v762_v9, %s602_s20  ;;  %220 = vrot.lane.b32.xlu1 %v765_v10, %s602_s20 }
  0xb4   : > { %v203_v43 = vpop.permute.xlu0 %202  ;;  %v207_v45 = vpop.permute.xlu1 %206 }
  0xb5   : > { %v222_v48 = vsub.f32 %v160_v1, %v203_v43  ;;  %v224_v49 = vsub.f32 %v162_v2, %v207_v45  ;;  %v190_v1 = vrot.slane %v762_v9, 1  ;;  %v191_v2 = vrot.slane %v765_v10, 1 }
  0xb7   : > { %v271_v56 = vmul.f32 %v222_v48, %v222_v48  ;;  %v273_v61 = vmul.f32 %v224_v49, %v224_v49  ;;  %v201_v26 = vsub.f32 %v765_v10, %v191_v2  ;;  %v268_v48 = vadd.f32 %v258_v32, %v248_v22 }
  0xb8   : > { %v205_v62 = vpop.permute.xlu0 %204  ;;  %v209_v63 = vpop.permute.xlu1 %208 }
  0xb9   : > { %v223_v11 = vsub.f32 %v738_v3, %v205_v62  ;;  %v225_v12 = vsub.f32 %v741_v4, %v209_v63  ;;  %v281_v19 = vadd.f32 %v271_v56, %v261_v44  ;;  %v283_v23 = vadd.f32 %v273_v61, %v263_v52 }
  0xba   : > { %v200_v4 = vsub.f32 %v762_v9, %v190_v1 }
  0xbb   : > { %v272_v20 = vmul.f32 %v223_v11, %v223_v11  ;;  %v274_v21 = vmul.f32 %v225_v12, %v225_v12  ;;  %v291_v35 = vmul.f32 %v786_v42, %v281_v19  ;;  %v293_v39 = vmul.f32 %v786_v42, %v283_v23 }
  0xbc   : > { %v211_v24 = vpop.permute.xlu0 %210  ;;  %v213_v3 = vpop.permute.xlu1 %212  ;;  %v259_v44 = vmul.f32 %v200_v4, %v200_v4 }
  0xbd   : > { %v282_v27 = vadd.f32 %v272_v20, %v262_v53  ;;  %v284_v28 = vadd.f32 %v274_v21, %v264_v57  ;;  %v226_v29 = vsub.f32 %v746_v5, %v211_v24  ;;  %v227_v30 = vsub.f32 %v749_v6, %v213_v3 }
  0xbe   : > { %v260_v5 = vmul.f32 %v201_v26, %v201_v26  ;;  %v269_v55 = vadd.f32 %v259_v44, %v249_v33 }
  0xbf   : > { %v292_v36 = vmul.f32 %v786_v42, %v282_v27  ;;  %v275_v37 = vmul.f32 %v226_v29, %v226_v29  ;;  %v276_v38 = vmul.f32 %v227_v30, %v227_v30  ;;  %v294_v40 = vmul.f32 %v786_v42, %v284_v28 }
  0xc0   : > { %v215_v41 = vpop.permute.xlu0 %214  ;;  %v217_v43 = vpop.permute.xlu1 %216  ;;  %v270_v57 = vadd.f32 %v260_v5, %v250_v34 }
  0xc1   : > { %v302_v45 = vadd.f32 %v292_v36, %v291_v35  ;;  %v285_v6 = vadd.f32 %v275_v37, %v265_v13  ;;  %v286_v46 = vadd.f32 %v276_v38, %v266_v25  ;;  %v228_v47 = vsub.f32 %v754_v7, %v215_v41 }
  0xc2   : > { %v229_v49 = vsub.f32 %v757_v8, %v217_v43 }
  0xc3   : > { %v303_v50 = vadd.f32 %v302_v45, %v293_v39  ;;  %v295_v51 = vmul.f32 %v786_v42, %v285_v6  ;;  %v277_v52 = vmul.f32 %v228_v47, %v228_v47  ;;  %v296_v53 = vmul.f32 %v786_v42, %v286_v46 }
  0xc4   : > { %v278_v54 = vmul.f32 %v229_v49, %v229_v49  ;;  %v219_v56 = vpop.permute.xlu0 %218  ;;  %v221_v58 = vpop.permute.xlu1 %220 }
  0xc5   : > { %v304_v59 = vadd.f32 %v303_v50, %v294_v40  ;;  %v287_v60 = vadd.f32 %v277_v52, %v267_v31  ;;  %v230_v61 = vsub.f32 %v762_v9, %v219_v56  ;;  %v231_v7 = vsub.f32 %v765_v10, %v221_v58 }
  0xc6   : > { %v288_v62 = vadd.f32 %v278_v54, %v268_v48 }
  0xc7   : > { %v305_v63 = vadd.f32 %v304_v59, %v295_v51  ;;  %v297_v8 = vmul.f32 %v786_v42, %v287_v60  ;;  %v279_v0 = vmul.f32 %v230_v61, %v230_v61  ;;  %v280_v1 = vmul.f32 %v231_v7, %v231_v7 }
  0xc8   : > { %v298_v11 = vmul.f32 %v786_v42, %v288_v62 }
  0xc9   : > { %v306_v2 = vadd.f32 %v305_v63, %v296_v53  ;;  %v289_v12 = vadd.f32 %v279_v0, %v269_v55  ;;  %v290_v13 = vadd.f32 %v280_v1, %v270_v57 }
  0xcb   : > { %v307_v14 = vadd.f32 %v306_v2, %v297_v8  ;;  %v299_v15 = vmul.f32 %v786_v42, %v289_v12  ;;  %v300_v17 = vmul.f32 %v786_v42, %v290_v13 }
  0xcd   : > { %v308_v16 = vadd.f32 %v307_v14, %v298_v11 }
  0xcf   : > { %v309_v9 = vadd.f32 %v308_v16, %v299_v15  ;;  %316 = sbr.rel (%p416_p7) target bundleno = 429 (0x1ad), region = 36 }
  0xd1   : > { %v310_v10 = vadd.f32 %v309_v9, %v300_v17 }
  0xd3   : > { %v311_v19 = vadd.f32 %v310_v10, %v301_v18 }
  0xd5   : > { %312 = vst [vmem:[#allocation2] sm:$0xff] %v311_v19 }
  0xdc   : > { %v317_v20 = vld [vmem:[#allocation2] sm:$0xff] }
  0xdd   : > { %318 = vadd.xlane.f32.xlu0 %v317_v20 }
 0x16a   : > { %v319_v21 = vpop.xlane.xlu0 %318 }
 0x16b   : > { %v320_v22 = vrot.slane %v319_v21, 4 }
 0x16d   : > { %v321_v23 = vadd.f32 %v320_v22, %v319_v21 }
 0x16f   : > { %v322_v24 = vrot.slane %v321_v23, 2 }
 0x171   : > { %v323_v25 = vadd.f32 %v322_v24, %v321_v23 }
 0x173   : > { %v324_v3 = vrot.slane %v323_v25, 1 }
 0x175   : > { %v325_v4 = vadd.f32 %v324_v3, %v323_v25 }
 0x177   : > { %422 = vpush %v325_v4 }
 0x1a8   : > { %s423_s5 = spop %422 }
 0x1a9   : > { %s327_s17 = smul.f32 0.125, %s423_s5 }
 0x1ab   : > { %v328_v42 = vstv %s327_s17 }
 0x1ac   : > { %330 = vst.msk [vmem:[%s154_s4] sm:$0x1] %vm329_vm3, %v328_v42 }
 0x1ad PF: > { %s14_s13 = sadd.s32 1, %s596_s13   ;;  %s856_s6 = smov %s572_s7 }
 0x1ae   : > { %p11_p6 = scmp.ge.s32.totalorder %s14_s13, 6   ;;  %s857_s7 = smov %s576_s8 }
 0x1af   : > { %s858_s8 = smov %s680_s27  ;;  %s859_s9 = smov %s588_s11 }
 0x1b0   : > { %s860_s10 = smov %s592_s12  ;;  %s861_s11 = smov %s864_s15 }
 0x1b1   : > { %s862_s12 = smov %s868_s16  ;;  %13 = sbr.rel (!%p11_p6) target bundleno = 5 (0x5), region = 72 }
 0x1b8   :  { %348 = vsyncpa [#allocation4], 1 }
 0x1b9   :  { %350 = vsyncpa [#allocation4 + $0x1], 1 }

</bundles_post_ra>
